<compile_context>
chip_gen: v7x
topology: tpu7x:2x2x1
jax: 0.10.0
libtpu: 0.0.40
codegen_flags: <defaults>
</compile_context>

<pallas_src>
import functools

import jax
import jax.numpy as jnp
from jax.experimental import pallas as pl
from jax.experimental.pallas import tpu as pltpu

LANE = 128  # lane width; all layer widths are zero-padded to this


def dueling_dqn_kernel(x_ref, w_ref, b_ref, out_ref, *, state_size, action_size):
    x = x_ref[...]                                     # (B, S)

    # ---- feature trunk -----------------------------------------------------
    # Layer 1: only the first `state_size` rows of the padded weight are live;
    # static ref slice avoids touching the rest.
    w1 = w_ref[0, :state_size, :]                      # (S, 128)
    h = jnp.dot(x, w1, preferred_element_type=jnp.float32) + b_ref[0]
    h = jnp.maximum(h, 0.0)

    # Layer 2: padded lanes of `h` are exactly zero, so the full padded
    # (128x128) matmul is exact.
    h = jnp.dot(h, w_ref[1], preferred_element_type=jnp.float32) + b_ref[1]
    h = jnp.maximum(h, 0.0)

    # ---- fused heads, layer 1 ----------------------------------------------
    # lanes [0:h2)  -> advantage hidden,  lanes [h2:2*h2) -> value hidden
    g = jnp.dot(h, w_ref[2], preferred_element_type=jnp.float32) + b_ref[2]
    g = jnp.maximum(g, 0.0)

    # ---- fused heads, layer 2 (block-diagonal) -------------------------------
    # lanes [0:A) -> advantage,  lane A -> value,  rest exact zeros
    y = jnp.dot(g, w_ref[3], preferred_element_type=jnp.float32) + b_ref[3]

    adv = y[:, :action_size]                           # (B, A)
    val = y[:, action_size:action_size + 1]            # (B, 1)

    # Global mean over ALL advantage elements (batch x actions) — matches the
    # PyTorch `advantage.mean()` with no dim argument.  Kept fused in-kernel
    # (the XLU cross-lane reduce slot is otherwise idle).
    mean_adv = jnp.mean(adv)

    # Lane-dense store of the full padded block; only the first `action_size`
    # lanes are meaningful (wrapper slices them out).
    out_ref[...] = val + (y - mean_adv)


def dueling_dqn_forward(x, w_pack, b_pack, *, action_size):
    """x: (B, state_size) f32.  w_pack: (4,128,128), b_pack: (4,1,128) from pack_params."""
    B, state_size = x.shape
    kernel = functools.partial(
        dueling_dqn_kernel, state_size=state_size, action_size=action_size)
    vmem = pl.BlockSpec(memory_space=pltpu.MemorySpace.VMEM)
    out_padded = pl.pallas_call(
        kernel,
        out_shape=jax.ShapeDtypeStruct((B, LANE), jnp.float32),
        in_specs=[vmem, vmem, vmem],
        out_specs=vmem,
    )(x, w_pack, b_pack)
    return out_padded[:, :action_size]


def init_params(key, state_size, action_size, hidden):
    """Deterministic init. Weights stored as (in, out) — i.e. PyTorch W.T."""
    h0, h1, h2 = hidden
    dims = [
        ("w1", (state_size, h0)), ("b1", (1, h0)),
        ("w2", (h0, h1)),         ("b2", (1, h1)),
        ("wa1", (h1, h2)),        ("ba1", (1, h2)),
        ("wa2", (h2, action_size)), ("ba2", (1, action_size)),
        ("wv1", (h1, h2)),        ("bv1", (1, h2)),
        ("wv2", (h2, 1)),         ("bv2", (1, 1)),
    ]
    params = {}
    keys = jax.random.split(key, len(dims))
    for (name, shape), k in zip(dims, keys):
        fan_in = shape[0] if name.startswith("w") else shape[1]
        bound = 1.0 / jnp.sqrt(jnp.float32(fan_in))
        params[name] = jax.random.uniform(
            k, shape, dtype=jnp.float32, minval=-bound, maxval=bound)
    return params


def pack_params(p, state_size, action_size, hidden):
    """One-time host-side packing: 12 tensors -> (4,128,128) weights + (4,1,128) biases.

    Layer 2 fuses the two head hidden layers side by side; layer 3 is the
    block-diagonal fusion of the two head output layers.
    """
    h0, h1, h2 = hidden
    assert max(state_size, h0, h1, 2 * h2, action_size + 1) <= LANE, \
        "layer widths must fit in one 128-lane pad"

    w_pack = jnp.zeros((4, LANE, LANE), jnp.float32)
    b_pack = jnp.zeros((4, 1, LANE), jnp.float32)

    # trunk
    w_pack = w_pack.at[0, :state_size, :h0].set(p["w1"])
    b_pack = b_pack.at[0, 0, :h0].set(p["b1"][0])
    w_pack = w_pack.at[1, :h0, :h1].set(p["w2"])
    b_pack = b_pack.at[1, 0, :h1].set(p["b2"][0])

    # fused head layer 1: [advantage hidden | value hidden]
    w_pack = w_pack.at[2, :h1, :h2].set(p["wa1"])
    w_pack = w_pack.at[2, :h1, h2:2 * h2].set(p["wv1"])
    b_pack = b_pack.at[2, 0, :h2].set(p["ba1"][0])
    b_pack = b_pack.at[2, 0, h2:2 * h2].set(p["bv1"][0])

    # fused head layer 2 (block-diagonal): adv -> lanes [0:A), val -> lane A
    w_pack = w_pack.at[3, :h2, :action_size].set(p["wa2"])
    w_pack = w_pack.at[3, h2:2 * h2, action_size:action_size + 1].set(p["wv2"])
    b_pack = b_pack.at[3, 0, :action_size].set(p["ba2"][0])
    b_pack = b_pack.at[3, 0, action_size:action_size + 1].set(p["bv2"][0])

    return w_pack, b_pack


def reference_forward(x, p):
    relu = lambda t: jnp.maximum(t, 0.0)
    h = relu(x @ p["w1"] + p["b1"])
    h = relu(h @ p["w2"] + p["b2"])
    adv = relu(h @ p["wa1"] + p["ba1"]) @ p["wa2"] + p["ba2"]
    val = relu(h @ p["wv1"] + p["bv1"]) @ p["wv2"] + p["bv2"]
    return val + (adv - jnp.mean(adv))


if __name__ == "__main__":
    # MountainCar-v0: state_size=2, action_size=3; small hidden layers.
    batch = 8
    state_size = 2
    action_size = 3
    hidden = (32, 32, 32)

    key = jax.random.PRNGKey(0)
    kx, kp = jax.random.split(key)
    x = jax.random.normal(kx, (batch, state_size), dtype=jnp.float32)
    params = init_params(kp, state_size, action_size, hidden)

    # One-time parameter packing (would be cached across environment steps).
    w_pack, b_pack = pack_params(params, state_size, action_size, hidden)

    out = dueling_dqn_forward(x, w_pack, b_pack, action_size=action_size)
    out = jax.block_until_ready(out)

    ref = reference_forward(x, params)
    assert out.shape == (batch, action_size)
    assert jnp.allclose(out, ref, atol=1e-5, rtol=1e-5), "mismatch vs JAX reference"
    print("KERNEL_OK")
</pallas_src>

<mosaic_0001>
module attributes {stable_mosaic.version = 11 : i64} {
  func.func @dueling_dqn_kernel(%arg0: memref<8x2xf32, #tpu.memory_space<vmem>>, %arg1: memref<4x128x128xf32, #tpu.memory_space<vmem>>, %arg2: memref<4x1x128xf32, #tpu.memory_space<vmem>>, %arg3: memref<8x128xf32, #tpu.memory_space<vmem>>) attributes {dimension_semantics = [], scalar_prefetch = 0 : i64, scratch_operands = 0 : i64, tpu.core_type = #tpu.core_type<tc>} {
    %c0 = arith.constant 0 : index
    %c0_0 = arith.constant 0 : index
    %0 = vector.load %arg0[%c0, %c0_0] : memref<8x2xf32, #tpu.memory_space<vmem>>, vector<8x2xf32>
    %c0_1 = arith.constant 0 : index
    %c0_2 = arith.constant 0 : index
    %c0_3 = arith.constant 0 : index
    %1 = vector.load %arg1[%c0_1, %c0_2, %c0_3] : memref<4x128x128xf32, #tpu.memory_space<vmem>>, vector<1x2x128xf32>
    %2 = vector.shape_cast %1 : vector<1x2x128xf32> to vector<2x128xf32>
    %cst = arith.constant dense<0.000000e+00> : vector<8x128xf32>
    %3 = tpu.matmul %0, %2, %cst {dimension_numbers = #tpu.dot_dimension_numbers<[1], [0], [0], [1], [0, 0, 1, 1], [], []>} : vector<8x2xf32>, vector<2x128xf32>, vector<8x128xf32> -> vector<8x128xf32>
    %c0_4 = arith.constant 0 : index
    %c0_5 = arith.constant 0 : index
    %c0_6 = arith.constant 0 : index
    %4 = vector.load %arg2[%c0_4, %c0_5, %c0_6] : memref<4x1x128xf32, #tpu.memory_space<vmem>>, vector<1x1x128xf32>
    %5 = vector.shape_cast %4 : vector<1x1x128xf32> to vector<1x128xf32>
    %6 = vector.broadcast %5 : vector<1x128xf32> to vector<8x128xf32>
    %7 = arith.addf %3, %6 : vector<8x128xf32>
    %cst_7 = arith.constant 0.000000e+00 : f32
    %8 = vector.broadcast %cst_7 : f32 to vector<8x128xf32>
    %9 = arith.maximumf %7, %8 : vector<8x128xf32>
    %c1 = arith.constant 1 : index
    %c0_8 = arith.constant 0 : index
    %c0_9 = arith.constant 0 : index
    %10 = vector.load %arg1[%c1, %c0_8, %c0_9] : memref<4x128x128xf32, #tpu.memory_space<vmem>>, vector<1x128x128xf32>
    %11 = vector.shape_cast %10 : vector<1x128x128xf32> to vector<128x128xf32>
    %cst_10 = arith.constant dense<0.000000e+00> : vector<8x128xf32>
    %12 = tpu.matmul %9, %11, %cst_10 {dimension_numbers = #tpu.dot_dimension_numbers<[1], [0], [0], [1], [0, 0, 1, 1], [], []>} : vector<8x128xf32>, vector<128x128xf32>, vector<8x128xf32> -> vector<8x128xf32>
    %c1_11 = arith.constant 1 : index
    %c0_12 = arith.constant 0 : index
    %c0_13 = arith.constant 0 : index
    %13 = vector.load %arg2[%c1_11, %c0_12, %c0_13] : memref<4x1x128xf32, #tpu.memory_space<vmem>>, vector<1x1x128xf32>
    %14 = vector.shape_cast %13 : vector<1x1x128xf32> to vector<1x128xf32>
    %15 = vector.broadcast %14 : vector<1x128xf32> to vector<8x128xf32>
    %16 = arith.addf %12, %15 : vector<8x128xf32>
    %cst_14 = arith.constant 0.000000e+00 : f32
    %17 = vector.broadcast %cst_14 : f32 to vector<8x128xf32>
    %18 = arith.maximumf %16, %17 : vector<8x128xf32>
    %c2 = arith.constant 2 : index
    %c0_15 = arith.constant 0 : index
    %c0_16 = arith.constant 0 : index
    %19 = vector.load %arg1[%c2, %c0_15, %c0_16] : memref<4x128x128xf32, #tpu.memory_space<vmem>>, vector<1x128x128xf32>
    %20 = vector.shape_cast %19 : vector<1x128x128xf32> to vector<128x128xf32>
    %cst_17 = arith.constant dense<0.000000e+00> : vector<8x128xf32>
    %21 = tpu.matmul %18, %20, %cst_17 {dimension_numbers = #tpu.dot_dimension_numbers<[1], [0], [0], [1], [0, 0, 1, 1], [], []>} : vector<8x128xf32>, vector<128x128xf32>, vector<8x128xf32> -> vector<8x128xf32>
    %c2_18 = arith.constant 2 : index
    %c0_19 = arith.constant 0 : index
    %c0_20 = arith.constant 0 : index
    %22 = vector.load %arg2[%c2_18, %c0_19, %c0_20] : memref<4x1x128xf32, #tpu.memory_space<vmem>>, vector<1x1x128xf32>
    %23 = vector.shape_cast %22 : vector<1x1x128xf32> to vector<1x128xf32>
    %24 = vector.broadcast %23 : vector<1x128xf32> to vector<8x128xf32>
    %25 = arith.addf %21, %24 : vector<8x128xf32>
    %cst_21 = arith.constant 0.000000e+00 : f32
    %26 = vector.broadcast %cst_21 : f32 to vector<8x128xf32>
    %27 = arith.maximumf %25, %26 : vector<8x128xf32>
    %c3 = arith.constant 3 : index
    %c0_22 = arith.constant 0 : index
    %c0_23 = arith.constant 0 : index
    %28 = vector.load %arg1[%c3, %c0_22, %c0_23] : memref<4x128x128xf32, #tpu.memory_space<vmem>>, vector<1x128x128xf32>
    %29 = vector.shape_cast %28 : vector<1x128x128xf32> to vector<128x128xf32>
    %cst_24 = arith.constant dense<0.000000e+00> : vector<8x128xf32>
    %30 = tpu.matmul %27, %29, %cst_24 {dimension_numbers = #tpu.dot_dimension_numbers<[1], [0], [0], [1], [0, 0, 1, 1], [], []>} : vector<8x128xf32>, vector<128x128xf32>, vector<8x128xf32> -> vector<8x128xf32>
    %c3_25 = arith.constant 3 : index
    %c0_26 = arith.constant 0 : index
    %c0_27 = arith.constant 0 : index
    %31 = vector.load %arg2[%c3_25, %c0_26, %c0_27] : memref<4x1x128xf32, #tpu.memory_space<vmem>>, vector<1x1x128xf32>
    %32 = vector.shape_cast %31 : vector<1x1x128xf32> to vector<1x128xf32>
    %33 = vector.broadcast %32 : vector<1x128xf32> to vector<8x128xf32>
    %34 = arith.addf %30, %33 : vector<8x128xf32>
    %35 = vector.extract_strided_slice %34 {offsets = [0, 0], sizes = [8, 3], strides = [1, 1]} : vector<8x128xf32> to vector<8x3xf32>
    %36 = vector.extract_strided_slice %34 {offsets = [0, 3], sizes = [8, 1], strides = [1, 1]} : vector<8x128xf32> to vector<8x1xf32>
    %37 = vector.shape_cast %35 : vector<8x3xf32> to vector<1x8x3xf32>
    %cst_28 = arith.constant dense<0.000000e+00> : vector<1xf32>
    %38 = vector.multi_reduction <add>, %37, %cst_28 [1, 2] : vector<1x8x3xf32> to vector<1xf32>
    %39 = vector.shape_cast %38 : vector<1xf32> to vector<1x1x1xf32>
    %40 = vector.extract %39[0, 0, 0] : f32 from vector<1x1x1xf32>
    %cst_29 = arith.constant 2.400000e+01 : f32
    %41 = arith.divf %40, %cst_29 : f32
    %42 = vector.broadcast %41 : f32 to vector<8x128xf32>
    %43 = arith.subf %34, %42 : vector<8x128xf32>
    %44 = vector.broadcast %36 : vector<8x1xf32> to vector<8x128xf32>
    %45 = arith.addf %44, %43 : vector<8x128xf32>
    %c0_30 = arith.constant 0 : index
    %c0_31 = arith.constant 0 : index
    %46 = vector.load %arg3[%c0_30, %c0_31] : memref<8x128xf32, #tpu.memory_space<vmem>>, vector<8x128xf32>
    tpu.vector_store %arg3[%c0_30, %c0_31], %45 {strides = array<i32>} : memref<8x128xf32, #tpu.memory_space<vmem>>, vector<8x128xf32>,
    return
  }
}

</mosaic_0001>

<bundles_post_ra>
// kernel: tpu_custom_call.1
= control target key start
LH: loop header
LB: loop body
LE: loop exit
PB: predicated region body
PF: predicated region fallthrough
CT: control target
= control target key end

     0   :  { %8 = vsyncpa [#allocation3], 0  ;;  %s845_s0 = inlined_call_operand.vmem [shape: f32[8,2], index: 0, kind: input, shape index: {}]   ;;  %s846_s1 = inlined_call_operand.hbm [shape: f32[4,128,128], index: 1, kind: input, shape index: {}]   ;;  %s847_s2 = inlined_call_operand.vmem [shape: f32[4,1,128], index: 2, kind: input, shape index: {}]   ;;  %s848_s3 = inlined_call_operand.hbm [shape: f32[8,128], index: 3, kind: output, shape index: {}]  }
   0x1   :  { %9 = vsyncpa [#allocation4], 0  ;;  %s745_s12 = smov [#allocation2]   ;;  %s697_s16 = scalar_lea.hbm %s846_s1, 8192 }
   0x2   :  { %s17_s13 = sshll.u32 %s745_s12, 4  ;;  %p698_p0 = scmp.ne.s32.totalorder %s846_s1, %s697_s16  ;;  %s18_s13 = int_to_ptr.vmem [resolvable:$true] %s17_s13 }
   0x3   :  { %p701_p1 = scmp.lt.u32.totalorder %s697_s16, %s846_s1 }
   0x5   :  { %p703_p2 = pnand %p701_p1, %p698_p0 }
   0x7   :  { %706 = shalt.err (!%p703_p2)
}
   0x8   :  { %s707_s21 = scalar_lea.vmem %s18_s13, 8192  ;;  %p712_p4 = scmp.lt.s32.totalorder %s18_s13, %s18_s13 }
   0x9   :  { %p708_p3 = scmp.ne.s32.totalorder %s18_s13, %s707_s21  ;;  %p713_p5 = scmp.lt.s32.totalorder %s707_s21, %s707_s21 }
   0xb   :  { %p714_p6 = por %p713_p5, %p712_p4 }
   0xd   :  { %p715_p7 = pnand %p714_p6, %p708_p3 }
   0xf   :  { %718 = shalt.err (!%p715_p7)
}
  0x10   :  { %s746_s22 = smov 128   ;;  %s747_s23 = smov 8  }
  0x11   :  { %23 = dma.hbm_to_vmem [thread:$0]  %s846_s1, 8192, %s18_s13, [#allocation3], %s746_s22, %s746_s22, %s747_s23  }
  0x12   :  { %741 = dma.done.wait [#allocation3], 8192  }
  0x13   :  { %742 = vsyncadd [#allocation3], 4294959104  ;;  %v748_v0 = vmov 0.0   ;;  %vm749_vm0 = vmmov 0   ;;  %v750_v1 = vmov 0.0|0.0   ;;  %vm42_vm1 = vcmask 1041408  }
  0x14   :  { %504 = vmatprep.subr.mxu0 %v748_v0  ;;  %506 = vmatprep.mubr.msk.f32.mxu0 %vm749_vm0, %v748_v0  ;;  %vm38_vm2 = vcmask 15360   ;;  %v30_v2 = vld [vmem:[#allocation2] sm:$0x3]  ;;  %v29_v3 = vld [vmem:[%s845_s0] sm:$0xff]  ;;  %v119_v5 = vld [vmem:[#allocation2 + $0x88] sm:$0xff]  ;;  %vm404_vm3 = vcmask 23552  }
  0x15   :  { %614 = vmatprep.subr.bf16.mxu1 %v750_v1  ;;  %541 = vmatprep.mubr.msk.f32.mxu1 %vm749_vm0, %v748_v0  ;;  %v118_v4 = vld [vmem:[#allocation2 + $0x80] sm:$0xff]  ;;  %v120_v6 = vld [vmem:[#allocation2 + $0x90] sm:$0xff]  ;;  %v121_v7 = vld [vmem:[#allocation2 + $0x98] sm:$0xff]  ;;  %s752_s9 = smov [#allocation5]  }
  0x16   :  { %505 = vmatpush3.msk.msra.mxu0 %vm42_vm1, %v30_v2  ;;  %v615_v8 = vpack.c.bf16 %v119_v5, %v118_v4  ;;  %v618_v9 = vpack.c.bf16 %v121_v7, %v120_v6  ;;  %v122_v10 = vld [vmem:[#allocation2 + $0xa0] sm:$0xff]  ;;  %v123_v11 = vld [vmem:[#allocation2 + $0xa8] sm:$0xff]  ;;  %v124_v13 = vld [vmem:[#allocation2 + $0xb0] sm:$0xff] }
  0x17   :  { %507 = vmatmul.mubr.msk.f32.vlgmr.msra.gmra.mrb[0].mxu0 %vm38_vm2, %v29_v3  ;;  %638 = vmatprep.subr.bf16.mxu0 %v750_v1  ;;  %v621_v12 = vpack.c.bf16 %v123_v11, %v122_v10  ;;  %v125_v14 = vld [vmem:[#allocation2 + $0xb8] sm:$0xff]  ;;  %v126_v16 = vld [vmem:[#allocation2 + $0xc0] sm:$0xff]  ;;  %v127_v17 = vld [vmem:[#allocation2 + $0xc8] sm:$0xff] }
  0x18   :  { %576 = vmatprep.mubr.msk.f32.mxu0 %vm749_vm0, %v748_v0  ;;  %616 = vmatpush3.bf16.msra.mxu1 %v615_v8  ;;  %v624_v15 = vpack.c.bf16 %v125_v14, %v124_v13  ;;  %v627_v18 = vpack.c.bf16 %v127_v17, %v126_v16  ;;  %v128_v19 = vld [vmem:[#allocation2 + $0xd0] sm:$0xff]  ;;  %v129_v20 = vld [vmem:[#allocation2 + $0xd8] sm:$0xff]  ;;  %v130_v22 = vld [vmem:[#allocation2 + $0xe0] sm:$0xff] }
  0x19   :  { %617 = vmatprep.subr.bf16.mxu1 %v750_v1  ;;  %v630_v21 = vpack.c.bf16 %v129_v20, %v128_v19  ;;  %v131_v23 = vld [vmem:[#allocation2 + $0xe8] sm:$0xff]  ;;  %v132_v25 = vld [vmem:[#allocation2 + $0xf0] sm:$0xff]  ;;  %v133_v26 = vld [vmem:[#allocation2 + $0xf8] sm:$0xff] }
  0x1a   :  { %v633_v24 = vpack.c.bf16 %v131_v23, %v130_v22  ;;  %v636_v27 = vpack.c.bf16 %v133_v26, %v132_v25  ;;  %v214_v28 = vld [vmem:[#allocation2 + $0x100] sm:$0xff]  ;;  %v215_v29 = vld [vmem:[#allocation2 + $0x108] sm:$0xff]  ;;  %v216_v30 = vld [vmem:[#allocation2 + $0x110] sm:$0xff] }
  0x1b   :  { %v639_v31 = vpack.c.bf16 %v215_v29, %v214_v28  ;;  %v217_v32 = vld [vmem:[#allocation2 + $0x118] sm:$0xff]  ;;  %v218_v34 = vld [vmem:[#allocation2 + $0x120] sm:$0xff]  ;;  %v219_v35 = vld [vmem:[#allocation2 + $0x128] sm:$0xff] }
  0x1c   :  { %619 = vmatpush3.bf16.msra.mxu1 %v618_v9  ;;  %v642_v33 = vpack.c.bf16 %v217_v32, %v216_v30  ;;  %v645_v36 = vpack.c.bf16 %v219_v35, %v218_v34  ;;  %v220_v37 = vld [vmem:[#allocation2 + $0x130] sm:$0xff]  ;;  %v221_v38 = vld [vmem:[#allocation2 + $0x138] sm:$0xff]  ;;  %v222_v40 = vld [vmem:[#allocation2 + $0x140] sm:$0xff] }
  0x1d   :  { %620 = vmatprep.subr.bf16.mxu1 %v750_v1  ;;  %640 = vmatpush3.bf16.msra.mxu0 %v639_v31  ;;  %v648_v39 = vpack.c.bf16 %v221_v38, %v220_v37  ;;  %v223_v41 = vld [vmem:[#allocation2 + $0x148] sm:$0xff]  ;;  %v224_v43 = vld [vmem:[#allocation2 + $0x150] sm:$0xff]  ;;  %v225_v44 = vld [vmem:[#allocation2 + $0x158] sm:$0xff] }
  0x1e   :  { %641 = vmatprep.subr.bf16.mxu0 %v750_v1  ;;  %v651_v42 = vpack.c.bf16 %v223_v41, %v222_v40  ;;  %v654_v45 = vpack.c.bf16 %v225_v44, %v224_v43  ;;  %v226_v46 = vld [vmem:[#allocation2 + $0x160] sm:$0xff]  ;;  %v227_v47 = vld [vmem:[#allocation2 + $0x168] sm:$0xff]  ;;  %v442_v49 = vld [vmem:[%s847_s2] ss:$0 sm:$0xff] }
  0x1f   :  { %v657_v48 = vpack.c.bf16 %v227_v47, %v226_v46  ;;  %v228_v54 = vld [vmem:[#allocation2 + $0x170] sm:$0xff]  ;;  %v229_v55 = vld [vmem:[#allocation2 + $0x178] sm:$0xff]  ;;  %v310_v57 = vld [vmem:[#allocation2 + $0x180] sm:$0xff] }
  0x20   :  { %622 = vmatpush3.bf16.msra.mxu1 %v621_v12  ;;  %v660_v56 = vpack.c.bf16 %v229_v55, %v228_v54  ;;  %v311_v58 = vld [vmem:[#allocation2 + $0x188] sm:$0xff]  ;;  %v312_v59 = vld [vmem:[#allocation2 + $0x190] sm:$0xff]  ;;  %v313_v61 = vld [vmem:[#allocation2 + $0x198] sm:$0xff] }
  0x21   :  { %623 = vmatprep.subr.bf16.mxu1 %v750_v1  ;;  %643 = vmatpush3.bf16.msra.mxu0 %v642_v33  ;;  %v663_v60 = vpack.c.bf16 %v311_v58, %v310_v57  ;;  %v666_v62 = vpack.c.bf16 %v313_v61, %v312_v59  ;;  %v314_v63 = vld [vmem:[#allocation2 + $0x1a0] sm:$0xff]  ;;  %v315_v2 = vld [vmem:[#allocation2 + $0x1a8] sm:$0xff]  ;;  %v317_v4 = vld [vmem:[#allocation2 + $0x1b8] sm:$0xff] }
  0x22   :  { %644 = vmatprep.subr.bf16.mxu0 %v750_v1  ;;  %v669_v3 = vpack.c.bf16 %v315_v2, %v314_v63  ;;  %v318_v6 = vld [vmem:[#allocation2 + $0x1c0] sm:$0xff]  ;;  %v319_v7 = vld [vmem:[#allocation2 + $0x1c8] sm:$0xff]  ;;  %v320_v9 = vld [vmem:[#allocation2 + $0x1d0] sm:$0xff] }
  0x23   :  { %v675_v8 = vpack.c.bf16 %v319_v7, %v318_v6  ;;  %v321_v10 = vld [vmem:[#allocation2 + $0x1d8] sm:$0xff]  ;;  %v322_v12 = vld [vmem:[#allocation2 + $0x1e0] sm:$0xff]  ;;  %v323_v13 = vld [vmem:[#allocation2 + $0x1e8] sm:$0xff] }
  0x24   :  { %625 = vmatpush3.bf16.msra.mxu1 %v624_v15  ;;  %v678_v11 = vpack.c.bf16 %v321_v10, %v320_v9  ;;  %v681_v14 = vpack.c.bf16 %v323_v13, %v322_v12  ;;  %v446_v15 = vld [vmem:[%s847_s2 + $0x1] ss:$0 sm:$0xff]  ;;  %v448_v23 = vld [vmem:[%s847_s2 + $0x2] ss:$0 sm:$0xff]  ;;  %v450_v28 = vld [vmem:[%s847_s2 + $0x3] ss:$0 sm:$0xff] }
  0x25   :  { %626 = vmatprep.subr.bf16.mxu1 %v750_v1  ;;  %646 = vmatpush3.bf16.msra.mxu0 %v645_v36  ;;  %v324_v20 = vld [vmem:[#allocation2 + $0x1f0] sm:$0xff]  ;;  %s433_s2 = sshll.u32 %s752_s9, 4  ;;  %s434_s2 = int_to_ptr.vmem [resolvable:$true] %s433_s2 }
  0x26   :  { %647 = vmatprep.subr.bf16.mxu0 %v750_v1  ;;  %s719_s10 = scalar_lea.vmem %s434_s2, 128  ;;  %p724_p9 = scmp.lt.s32.totalorder %s434_s2, %s434_s2 }
  0x27   :  { %p720_p8 = scmp.ne.s32.totalorder %s434_s2, %s719_s10  ;;  %p725_p10 = scmp.lt.s32.totalorder %s719_s10, %s719_s10 }
  0x28   :  { %628 = vmatpush3.bf16.msra.mxu1 %v627_v18 }
  0x29   :  { %629 = vmatprep.subr.bf16.mxu1 %v750_v1  ;;  %649 = vmatpush3.bf16.msra.mxu0 %v648_v39  ;;  %p726_p11 = por %p725_p10, %p724_p9 }
  0x2a   :  { %650 = vmatprep.subr.bf16.mxu0 %v750_v1 }
  0x2b   :  { %p727_p12 = pnand %p726_p11, %p720_p8 }
  0x2c   :  { %631 = vmatpush3.bf16.msra.mxu1 %v630_v21  ;;  %v325_v21 = vld [vmem:[#allocation2 + $0x1f8] sm:$0xff] }
  0x2d   :  { %632 = vmatprep.subr.bf16.mxu1 %v750_v1  ;;  %652 = vmatpush3.bf16.msra.mxu0 %v651_v42  ;;  %v684_v22 = vpack.c.bf16 %v325_v21, %v324_v20 }
  0x2e   :  { %653 = vmatprep.subr.bf16.mxu0 %v750_v1 }
  0x30   :  { %634 = vmatpush3.bf16.msra.mxu1 %v633_v24 }
  0x31   :  { %635 = vmatprep.subr.bf16.mxu1 %v750_v1  ;;  %655 = vmatpush3.bf16.msra.mxu0 %v654_v45 }
  0x32   :  { %656 = vmatprep.subr.bf16.mxu0 %v750_v1 }
  0x34   :  { %637 = vmatpush3.bf16.msra.mxu1 %v636_v27  ;;  %v751_v27 = vmov 3  }
  0x35   :  { %662 = vmatprep.subr.bf16.mxu1 %v750_v1  ;;  %658 = vmatpush3.bf16.msra.mxu0 %v657_v48 }
  0x36   :  { %659 = vmatprep.subr.bf16.mxu0 %v750_v1  ;;  %696 = vset.pattern.permute.xlu0 %v751_v27 }
  0x39   :  { %661 = vmatpush3.bf16.msra.mxu0 %v660_v56 }
  0xea   :  { %v112_v50 = vpop.f32.mrb[0].mxu0 }
  0xeb   :  { %v113_v51 = vadd.f32 %v442_v49, %v112_v50  ;;  %v508_v52 = vpop.f32.mrb[1].mxu0 }
  0xed   :  { %v116_v53 = vmax.f32 %v113_v51, 0.0 }
  0xef   :  { %542 = vmatmul.mubr.f32.vlgmr.msra.gmra.mrb[0].mxu1 %v116_v53 }
  0xf0   :  { %611 = vmatprep.mubr.msk.f32.mxu1 %vm749_vm0, %v748_v0  ;;  %664 = vmatpush3.bf16.msra.mxu1 %v663_v60  ;;  %v316_v0 = vld [vmem:[#allocation2 + $0x1b0] sm:$0xff] }
  0xf1   :  { %665 = vmatprep.subr.bf16.mxu1 %v750_v1  ;;  %v672_v5 = vpack.c.bf16 %v317_v4, %v316_v0 }
  0xf4   :  { %667 = vmatpush3.bf16.msra.mxu1 %v666_v62 }
  0xf5   :  { %668 = vmatprep.subr.bf16.mxu1 %v750_v1 }
  0xf8   :  { %670 = vmatpush3.bf16.msra.mxu1 %v669_v3 }
  0xf9   :  { %671 = vmatprep.subr.bf16.mxu1 %v750_v1 }
  0xfc   :  { %673 = vmatpush3.bf16.msra.mxu1 %v672_v5 }
  0xfd   :  { %674 = vmatprep.subr.bf16.mxu1 %v750_v1 }
 0x100   :  { %676 = vmatpush3.bf16.msra.mxu1 %v675_v8 }
 0x101   :  { %677 = vmatprep.subr.bf16.mxu1 %v750_v1 }
 0x104   :  { %679 = vmatpush3.bf16.msra.mxu1 %v678_v11 }
 0x105   :  { %680 = vmatprep.subr.bf16.mxu1 %v750_v1 }
 0x108   :  { %682 = vmatpush3.bf16.msra.mxu1 %v681_v14 }
 0x109   :  { %683 = vmatprep.subr.bf16.mxu1 %v750_v1 }
 0x10c   :  { %685 = vmatpush3.bf16.msra.mxu1 %v684_v22 }
 0x1c2   :  { %v208_v16 = vpop.f32.mrb[0].mxu1 }
 0x1c3   :  { %v209_v17 = vadd.f32 %v446_v15, %v208_v16  ;;  %v543_v18 = vpop.f32.mrb[1].mxu1 }
 0x1c5   :  { %v212_v19 = vmax.f32 %v209_v17, 0.0 }
 0x1c7   :  { %577 = vmatmul.mubr.f32.vlgmr.msra.gmra.mrb[2].mxu0 %v212_v19 }
 0x29a   :  { %v304_v24 = vpop.f32.mrb[2].mxu0 }
 0x29b   :  { %v305_v25 = vadd.f32 %v448_v23, %v304_v24  ;;  %v578_v1 = vpop.f32.mrb[3].mxu0 }
 0x29d   :  { %v308_v26 = vmax.f32 %v305_v25, 0.0 }
 0x29f   :  { %612 = vmatmul.mubr.f32.vlgmr.msra.gmra.mrb[2].mxu1 %v308_v26 }
 0x372   :  { %v400_v29 = vpop.f32.mrb[2].mxu1 }
 0x373   :  { %v401_v30 = vadd.f32 %v450_v28, %v400_v29  ;;  %v613_v31 = vpop.f32.mrb[3].mxu1 }
 0x375   :  { %v405_v32 = vsel %vm404_vm3, %v401_v30, 0.0 }
 0x376   :  { %406 = vadd.xlane.f32.xlu0 %v405_v32 }
 0x38c   :  { %422 = vperm.xlu0 %696, %v401_v30  }
 0x403   :  { %v407_v33 = vpop.xlane.xlu0 %406 }
 0x404   :  { %v408_v34 = vrot.slane %v407_v33, 4 }
 0x406   :  { %v409_v35 = vadd.f32 %v408_v34, %v407_v33 }
 0x408   :  { %v410_v36 = vrot.slane %v409_v35, 2 }
 0x40a   :  { %v411_v37 = vadd.f32 %v410_v36, %v409_v35 }
 0x40b   :  { %v423_v42 = vpop.permute.xlu0 %422 }
 0x40c   :  { %v412_v38 = vrot.slane %v411_v37, 1 }
 0x40e   :  { %v413_v39 = vadd.f32 %v412_v38, %v411_v37 }
 0x410   :  { %686 = vpush %v413_v39 }
 0x441   :  { %s687_s7 = spop %686 }
 0x442   :  { %s417_s8 = smul.f32 0.041666668, %s687_s7 }
 0x444   :  { %v418_v40 = vstv %s417_s8 }
 0x445   :  { %v419_v41 = vsub.f32 %v401_v30, %v418_v40 }
 0x447   :  { %v425_v43 = vadd.f32 %v423_v42, %v419_v41 }
 0x449   :  { %426 = vst [vmem:[#allocation5] sm:$0xff] %v425_v43 }
 0x44a   :  { %730 = shalt.err (!%p727_p12)
}
 0x44b   :  { %s731_s13 = scalar_lea.hbm %s848_s3, 128 }
 0x44c   :  { %p732_p13 = scmp.ne.s32.totalorder %s848_s3, %s731_s13  ;;  %p735_p0 = scmp.lt.u32.totalorder %s731_s13, %s848_s3 }
 0x44e   :  { %p737_p1 = pnand %p735_p0, %p732_p13 }
 0x450   :  { %740 = shalt.err (!%p737_p1)
}
 0x451   :  { %436 = dma.vmem_to_hbm [thread:$0]  %s434_s2, 128, %s848_s3, [#allocation4]  }
 0x452   :  { %743 = dma.done.wait [#allocation4], 128  }
 0x453   :  { %744 = vsyncadd [#allocation4], 4294967168 }
 0x454   :  { %440 = vsyncpa [#allocation3], 1 }
 0x455   :  { %441 = vsyncpa [#allocation4], 1 }

</bundles_post_ra>
